<compile_context>
chip_gen: v6e
topology: v6e:2x2x1
jax: 0.10.0
libtpu: 0.0.40
codegen_flags: <defaults>
</compile_context>

<pallas_src>
import math

import jax
import jax.numpy as jnp
from jax import lax
from jax.experimental import pallas as pl
from jax.experimental.pallas import tpu as pltpu


def _round_up(a, m):
    return (a + m - 1) // m * m


def _vmem_limit_bytes(default=48 * 1024 * 1024):
    """Generation-aware scoped-VMEM cap: ~48 MiB on v7x (64 MiB physical),
    96 MiB on v5e/v6e (128 MiB physical)."""
    try:
        cap = pltpu.get_tpu_info().vmem_capacity_bytes
        if cap >= 100 * 1024 * 1024:          # v5e / v6e
            return 96 * 1024 * 1024
        return min(default, int(cap * 3 // 4))  # v7x and smaller
    except Exception:
        return default


def _tile_and_pad(dim, candidates, align):
    """(tile, padded_dim) for one axis.  Prefers the full dim (no padding;
    full-dim blocks are exempt from the (8,128) rule), then a large candidate
    dividing the align-rounded dim; pads only as a last resort."""
    if dim <= candidates[0]:
        return dim, dim
    d = _round_up(dim, align)
    for c in candidates:
        if d % c == 0:
            return c, d
    d = _round_up(dim, candidates[-1])
    return candidates[-1], d


# -----------------------------------------------------------------------------
# Stage 1: xw = x_flat @ W   (single large lane-dense GEMM over all graphs)
# -----------------------------------------------------------------------------
def _matmul_kernel(a_ref, b_ref, o_ref, acc_ref):
    @pl.when(pl.program_id(2) == 0)
    def _():
        acc_ref[...] = jnp.zeros_like(acc_ref)

    acc_ref[...] += jnp.dot(a_ref[...], b_ref[...],
                            preferred_element_type=jnp.float32)

    @pl.when(pl.program_id(2) == pl.num_programs(2) - 1)
    def _():
        o_ref[...] = acc_ref[...].astype(o_ref.dtype)


def _feature_transform(x_flat, w, *, tm, tn, tk, out_dtype, vmem_limit):
    M, K = x_flat.shape
    _, N = w.shape
    return pl.pallas_call(
        _matmul_kernel,
        out_shape=jax.ShapeDtypeStruct((M, N), out_dtype),
        grid_spec=pltpu.PrefetchScalarGridSpec(
            num_scalar_prefetch=0,
            grid=(M // tm, N // tn, K // tk),
            in_specs=[
                pl.BlockSpec((tm, tk), lambda i, j, k: (i, k)),
                pl.BlockSpec((tk, tn), lambda i, j, k: (k, j)),
            ],
            out_specs=pl.BlockSpec((tm, tn), lambda i, j, k: (i, j)),
            scratch_shapes=[pltpu.VMEM((tm, tn), jnp.float32)],
        ),
        compiler_params=pltpu.CompilerParams(
            dimension_semantics=("parallel", "parallel", "arbitrary"),
            vmem_limit_bytes=vmem_limit,
        ),
    )(x_flat, w)


# -----------------------------------------------------------------------------
# Stage 2: z = adj @ xw  (+ xw if add_self) (+ bias), then optional L2 normalize
# xw is a per-batch VMEM-resident slab; only adj is streamed.
# -----------------------------------------------------------------------------
def _make_agg_kernel(*, add_self, use_bias, normalize, TM, TK, N_pad):
    def kernel(*refs):
        adj_ref, xw_ref = refs[0], refs[1]
        idx = 2
        b_ref = None
        if use_bias:
            b_ref = refs[idx]
            idx += 1
        o_ref = refs[idx]
        acc_ref = refs[idx + 1]

        k = pl.program_id(2)

        @pl.when(k == 0)
        def _():
            acc_ref[...] = jnp.zeros_like(acc_ref)

        # K-slice of the resident xw slab (no per-step xw DMA).
        if TK == N_pad:
            xw_k = xw_ref[0]
        else:
            koff = pl.multiple_of(k * TK, TK)
            xw_k = xw_ref[0, pl.ds(koff, TK), :]

        # Neighborhood aggregation: MXU matmul with f32 accumulation.
        acc_ref[...] += jnp.dot(adj_ref[0], xw_k,
                                preferred_element_type=jnp.float32)

        @pl.when(k == pl.num_programs(2) - 1)
        def _():
            z = acc_ref[...]
            if add_self:
                # Self rows come straight from the already-resident xw slab.
                if TM == N_pad:
                    xw_m = xw_ref[0]
                else:
                    moff = pl.multiple_of(pl.program_id(1) * TM, TM)
                    xw_m = xw_ref[0, pl.ds(moff, TM), :]
                z = z + xw_m.astype(jnp.float32)
            if use_bias:
                z = z + b_ref[...].astype(jnp.float32)
            if normalize:
                # F.normalize(p=2, dim=2): y / max(||y||_2, 1e-12)
                ss = jnp.sum(z * z, axis=-1, keepdims=True)
                z = z * lax.rsqrt(jnp.maximum(ss, 1e-24))
            o_ref[0] = z.astype(o_ref.dtype)

    return kernel


def graph_conv(x, adj, weight, bias=None, *, add_self=False,
               normalize_embedding=False, dropout=0.0, key=None,
               matmul_dtype=None):
    """Pallas GraphConv forward. x: (B,N,Din), adj: (B,N,N), W: (Din,Dout)."""
    B, N, Din = x.shape
    Dout = weight.shape[1]
    out_dtype = x.dtype
    use_bias = bias is not None

    if dropout > 0.001:
        # TODO(synk): fuse the dropout mask into stage 1 with pltpu.prng_random_bits.
        assert key is not None
        keep = 1.0 - dropout
        mask = jax.random.bernoulli(key, keep, x.shape)
        x = jnp.where(mask, x / keep, 0.0).astype(x.dtype)

    # Default f32 keeps the module-exact semantics.  matmul_dtype=jnp.bfloat16
    # halves adj/xw HBM traffic and uses the native bf16 MXU path (adjacency
    # 0/1 is exact in bf16; xw rounds to ~1e-3 rel).  Accumulation/epilogue f32.
    mm_dtype = jnp.dtype(matmul_dtype) if matmul_dtype is not None else jnp.dtype(x.dtype)
    sub = 16 if mm_dtype == jnp.bfloat16 else 8
    vmem_limit = _vmem_limit_bytes()

    # Lane-dense output features (zero padding -> math and L2 norm unchanged).
    Dout_p = _round_up(Dout, 128)

    # ---- Stage 1: xw = x @ W, flattened over (B*N) rows ----
    BN = B * N
    tm_x, BN_p = _tile_and_pad(BN, (512, 256, 128), sub)
    # Din is NOT padded: a full-dim K block is exempt from the 128-lane rule.
    if Din % 128 == 0:
        tk_x = next(c for c in (512, 256, 128) if Din % c == 0)
    else:
        tk_x = Din
    tn_x = next((c for c in (512, 256, 128) if Dout_p % c == 0), Dout_p)

    x_flat = x.reshape(BN, Din)
    if x_flat.dtype != mm_dtype:
        x_flat = x_flat.astype(mm_dtype)
    if BN_p != BN:
        x_flat = jnp.pad(x_flat, ((0, BN_p - BN), (0, 0)))
    w_p = weight.astype(mm_dtype)
    if Dout_p != Dout:
        w_p = jnp.pad(w_p, ((0, 0), (0, Dout_p - Dout)))

    xw = _feature_transform(x_flat, w_p, tm=tm_x, tn=tn_x, tk=tk_x,
                            out_dtype=mm_dtype, vmem_limit=vmem_limit)
    if BN_p != BN:
        xw = xw[:BN]
    xw = xw.reshape(B, N, Dout_p)

    # ---- Stage 2: tiled batched aggregation with fused epilogue ----
    if N <= 1024:
        # Whole (N, N) adjacency slice fits VMEM; full-dim blocks -> no adj
        # padding pass at all, regardless of 8/128 alignment.
        TM = TK = N_pad = N
        if B == 1 and N % (2 * sub) == 0 and N >= 2 * sub:
            TM = N // 2      # give v7x's 2 TensorCores >=2 parallel row tiles
    else:
        N_pad = N if N % 128 == 0 else _round_up(N, 128)
        TK = next(c for c in (1024, 512, 256, 128) if N_pad % c == 0)
        TM = next(c for c in (512, 256, 128) if N_pad % c == 0)
    # TODO(synk): for N beyond ~16K (f32) / ~32K (bf16) the per-batch resident
    # xw slab would exceed v7x VMEM; fall back to streaming xw per K tile there.

    adj_in = adj if adj.dtype == mm_dtype else adj.astype(mm_dtype)
    if N_pad != N:
        adj_in = jnp.pad(adj_in, ((0, 0), (0, N_pad - N), (0, N_pad - N)))
        xw = jnp.pad(xw, ((0, 0), (0, N_pad - N), (0, 0)))

    in_specs = [
        # Streamed adjacency tiles (the only large HBM stream).
        pl.BlockSpec((1, TM, TK), lambda b, m, k: (b, m, k)),
        # Whole per-batch xw slab: DMA'd once per batch, VMEM-resident; serves
        # both the K contraction slices and the add_self rows.
        pl.BlockSpec((1, N_pad, Dout_p), lambda b, m, k: (b, 0, 0)),
    ]
    inputs = [adj_in, xw]

    if use_bias:
        b_p = bias.astype(jnp.float32)
        if Dout_p != Dout:
            b_p = jnp.pad(b_p, (0, Dout_p - Dout))
        in_specs.append(pl.BlockSpec((1, Dout_p), lambda b, m, k: (0, 0)))
        inputs.append(b_p.reshape(1, Dout_p))

    out = pl.pallas_call(
        _make_agg_kernel(add_self=add_self, use_bias=use_bias,
                         normalize=normalize_embedding,
                         TM=TM, TK=TK, N_pad=N_pad),
        out_shape=jax.ShapeDtypeStruct((B, N_pad, Dout_p), out_dtype),
        grid_spec=pltpu.PrefetchScalarGridSpec(
            num_scalar_prefetch=0,
            grid=(B, N_pad // TM, N_pad // TK),
            in_specs=in_specs,
            out_specs=pl.BlockSpec((1, TM, Dout_p), lambda b, m, k: (b, m, 0)),
            scratch_shapes=[pltpu.VMEM((TM, Dout_p), jnp.float32)],
        ),
        compiler_params=pltpu.CompilerParams(
            dimension_semantics=("parallel", "parallel", "arbitrary"),
            vmem_limit_bytes=vmem_limit,
        ),
    )(*inputs)

    if N_pad != N or Dout_p != Dout:
        out = out[:, :N, :Dout]
    return out


# -----------------------------------------------------------------------------
# Reference + test
# -----------------------------------------------------------------------------
def _reference(x, adj, weight, bias, add_self, normalize_embedding):
    y = jnp.einsum("bij,bjd->bid", adj, x)
    if add_self:
        y = y + x
    y = jnp.einsum("bid,de->bie", y, weight)
    if bias is not None:
        y = y + bias
    if normalize_embedding:
        n = jnp.maximum(jnp.linalg.norm(y, axis=2, keepdims=True), 1e-12)
        y = y / n
    return y


if __name__ == "__main__":
    B, N = 2, 16
    input_dim, output_dim = 32, 32
    add_self = True
    normalize_embedding = True

    key = jax.random.PRNGKey(0)
    k_x, k_adj, k_w, k_b = jax.random.split(key, 4)

    x = jax.random.normal(k_x, (B, N, input_dim), dtype=jnp.float32)
    adj_raw = jax.random.uniform(k_adj, (B, N, N), dtype=jnp.float32)
    adj = (adj_raw > 0.7).astype(jnp.float32)  # sparse-ish 0/1 adjacency

    # Parameter init matching reset_parameters(): U(-stdv, stdv), stdv=1/sqrt(Dout)
    stdv = 1.0 / math.sqrt(output_dim)
    weight = jax.random.uniform(k_w, (input_dim, output_dim),
                                minval=-stdv, maxval=stdv, dtype=jnp.float32)
    bias = jax.random.uniform(k_b, (output_dim,),
                              minval=-stdv, maxval=stdv, dtype=jnp.float32)

    ref = _reference(x, adj, weight, bias, add_self, normalize_embedding)

    # Exact (f32) path: must match the PyTorch semantics to 1e-5.
    out = graph_conv(x, adj, weight, bias,
                     add_self=add_self,
                     normalize_embedding=normalize_embedding)
    out = jax.block_until_ready(out)
    assert out.shape == (B, N, output_dim)
    assert jnp.allclose(out, ref, atol=1e-5, rtol=1e-5), "mismatch vs reference (f32)"

    # bias=None / add_self=False / no-normalize path (no bias DMA at all).
    out2 = graph_conv(x, adj, weight, None, add_self=False,
                      normalize_embedding=False)
    out2 = jax.block_until_ready(out2)
    ref2 = _reference(x, adj, weight, None, False, False)
    assert jnp.allclose(out2, ref2, atol=1e-5, rtol=1e-5), "mismatch (no bias)"

    # bf16 fast path: halved adj/xw HBM traffic, native bf16 MXU, f32 accum.
    out3 = graph_conv(x, adj, weight, bias,
                      add_self=add_self,
                      normalize_embedding=normalize_embedding,
                      matmul_dtype=jnp.bfloat16)
    out3 = jax.block_until_ready(out3)
    assert jnp.allclose(out3, ref, atol=2e-2, rtol=2e-2), "mismatch (bf16 path)"

    print("KERNEL_OK")
</pallas_src>

<mosaic_0001>
module attributes {stable_mosaic.version = 11 : i64} {
  func.func @_matmul_kernel(%arg0: i32, %arg1: i32, %arg2: i32, %arg3: memref<32x32xf32, #tpu.memory_space<vmem>>, %arg4: memref<32x128xf32, #tpu.memory_space<vmem>>, %arg5: memref<32x128xf32, #tpu.memory_space<vmem>>, %arg6: memref<32x128xf32, #tpu.memory_space<vmem>>) attributes {dimension_semantics = [#tpu.dimension_semantics<parallel>, #tpu.dimension_semantics<parallel>, #tpu.dimension_semantics<arbitrary>], iteration_bounds = array<i64: 1, 1, 1>, scalar_prefetch = 0 : i64, scratch_operands = 1 : i64, tpu.core_type = #tpu.core_type<tc>, window_params = [{transform_indices = @transform_0, window_bounds = array<i64: 32, 32>}, {transform_indices = @transform_1, window_bounds = array<i64: 32, 128>}, {transform_indices = @transform_2, window_bounds = array<i64: 32, 128>}]} {
    %c0_i32 = arith.constant 0 : i32
    %0 = arith.cmpi eq, %arg2, %c0_i32 : i32
    %1 = arith.extui %0 : i1 to i32
    %c0_i32_0 = arith.constant 0 : i32
    %2 = arith.cmpi ne, %1, %c0_i32_0 : i32
    scf.if %2 {
      %cst_10 = arith.constant 0.000000e+00 : f32
      %12 = vector.broadcast %cst_10 : f32 to vector<32x128xf32>
      %c0_11 = arith.constant 0 : index
      %c0_12 = arith.constant 0 : index
      %13 = vector.load %arg6[%c0_11, %c0_12] : memref<32x128xf32, #tpu.memory_space<vmem>>, vector<32x128xf32>
      tpu.vector_store %arg6[%c0_11, %c0_12], %12 {strides = array<i32>} : memref<32x128xf32, #tpu.memory_space<vmem>>, vector<32x128xf32>,
    } else {
    }
    %c0 = arith.constant 0 : index
    %c0_1 = arith.constant 0 : index
    %3 = vector.load %arg6[%c0, %c0_1] : memref<32x128xf32, #tpu.memory_space<vmem>>, vector<32x128xf32>
    %c0_2 = arith.constant 0 : index
    %c0_3 = arith.constant 0 : index
    %4 = vector.load %arg3[%c0_2, %c0_3] : memref<32x32xf32, #tpu.memory_space<vmem>>, vector<32x32xf32>
    %c0_4 = arith.constant 0 : index
    %c0_5 = arith.constant 0 : index
    %5 = vector.load %arg4[%c0_4, %c0_5] : memref<32x128xf32, #tpu.memory_space<vmem>>, vector<32x128xf32>
    %cst = arith.constant dense<0.000000e+00> : vector<32x128xf32>
    %6 = tpu.matmul %4, %5, %cst {dimension_numbers = #tpu.dot_dimension_numbers<[1], [0], [0], [1], [0, 0, 1, 1], [], []>} : vector<32x32xf32>, vector<32x128xf32>, vector<32x128xf32> -> vector<32x128xf32>
    %7 = arith.addf %3, %6 : vector<32x128xf32>
    %c0_6 = arith.constant 0 : index
    %c0_7 = arith.constant 0 : index
    %8 = vector.load %arg6[%c0_6, %c0_7] : memref<32x128xf32, #tpu.memory_space<vmem>>, vector<32x128xf32>
    tpu.vector_store %arg6[%c0_6, %c0_7], %7 {strides = array<i32>} : memref<32x128xf32, #tpu.memory_space<vmem>>, vector<32x128xf32>,
    %c0_i32_8 = arith.constant 0 : i32
    %9 = arith.cmpi eq, %arg2, %c0_i32_8 : i32
    %10 = arith.extui %9 : i1 to i32
    %c0_i32_9 = arith.constant 0 : i32
    %11 = arith.cmpi ne, %10, %c0_i32_9 : i32
    scf.if %11 {
      %c0_10 = arith.constant 0 : index
      %c0_11 = arith.constant 0 : index
      %12 = vector.load %arg6[%c0_10, %c0_11] : memref<32x128xf32, #tpu.memory_space<vmem>>, vector<32x128xf32>
      %c0_12 = arith.constant 0 : index
      %c0_13 = arith.constant 0 : index
      %13 = vector.load %arg5[%c0_12, %c0_13] : memref<32x128xf32, #tpu.memory_space<vmem>>, vector<32x128xf32>
      tpu.vector_store %arg5[%c0_12, %c0_13], %12 {strides = array<i32>} : memref<32x128xf32, #tpu.memory_space<vmem>>, vector<32x128xf32>,
    } else {
    }
    return
  }
  func.func @transform_0(%arg0: i32, %arg1: i32, %arg2: i32) -> (i32, i32) {
    %c0_i32 = arith.constant 0 : i32
    return %arg0, %arg2 : i32, i32
  }
  func.func @transform_1(%arg0: i32, %arg1: i32, %arg2: i32) -> (i32, i32) {
    %c0_i32 = arith.constant 0 : i32
    return %arg2, %arg1 : i32, i32
  }
  func.func @transform_2(%arg0: i32, %arg1: i32, %arg2: i32) -> (i32, i32) {
    %c0_i32 = arith.constant 0 : i32
    return %arg0, %arg1 : i32, i32
  }
}

</mosaic_0001>

<bundles_post_ra>
// kernel: tpu_custom_call.1
= control target key start
LH: loop header
LB: loop body
LE: loop exit
PB: predicated region body
PF: predicated region fallthrough
CT: control target
= control target key end

     0   :  { %7 = vsyncpa [#allocation4], 0  ;;  %s338_s0 = inlined_call_operand.hbm [shape: f32[32,32], index: 0, kind: input, shape index: {}]   ;;  %s339_s1 = inlined_call_operand.hbm [shape: f32[32,128], index: 1, kind: input, shape index: {}]   ;;  %s340_s2 = inlined_call_operand.hbm [shape: f32[32,128], index: 2, kind: output, shape index: {}]  }
   0x1   :  { %8 = vsyncpa [#allocation7], 0 }
   0x2   :  { %9 = vsyncpa [#allocation5], 0  ;;  %s300_s9 = smov [#allocation3]  }
   0x3   :  { %s15_s10 = sshll.u32 %s300_s9, 4  ;;  %s16_s10 = int_to_ptr.vmem [resolvable:$true] %s15_s10 }
   0x4   :  { %s242_s11 = scalar_lea.vmem %s16_s10, 512  ;;  %p247_p1 = scmp.lt.s32.totalorder %s16_s10, %s16_s10 }
   0x5   :  { %p243_p0 = scmp.ne.s32.totalorder %s16_s10, %s242_s11  ;;  %p248_p2 = scmp.lt.s32.totalorder %s242_s11, %s242_s11 }
   0x7   :  { %p249_p3 = por %p248_p2, %p247_p1 }
   0x9   :  { %p250_p4 = pnand %p249_p3, %p243_p0 }
   0xb   :  { %253 = shalt.err (!%p250_p4)
}
   0xc   :  { %s301_s12 = smov 128   ;;  %s302_s13 = smov 8  }
   0xd   :  { %21 = dma.hbm_to_vmem [thread:$0]  %s338_s0, 512, %s16_s10, [#allocation4], %s301_s12, %s301_s12, %s302_s13  }
   0xe   :  { %s303_s16 = smov [#allocation6]  }
   0xf   :  { %s27_s17 = sshll.u32 %s303_s16, 4  ;;  %s28_s17 = int_to_ptr.vmem [resolvable:$true] %s27_s17 }
  0x10   :  { %s262_s18 = scalar_lea.vmem %s28_s17, 512  ;;  %p267_p6 = scmp.lt.s32.totalorder %s28_s17, %s28_s17 }
  0x11   :  { %p263_p5 = scmp.ne.s32.totalorder %s28_s17, %s262_s18  ;;  %p268_p7 = scmp.lt.s32.totalorder %s262_s18, %s262_s18 }
  0x13   :  { %p269_p8 = por %p268_p7, %p267_p6 }
  0x15   :  { %p270_p9 = pnand %p269_p8, %p263_p5 }
  0x17   :  { %273 = shalt.err (!%p270_p9)
}
  0x18   :  { %33 = dma.hbm_to_vmem [thread:$0]  %s339_s1, 512, %s28_s17, [#allocation7], %s301_s12, %s301_s12, %s302_s13  }
  0x19   :  { %294 = dma.done.wait [#allocation4], 512  }
  0x1a   :  { %295 = vsyncadd [#allocation4], 4294966784 }
  0x1b   :  { %296 = dma.done.wait [#allocation7], 512  }
  0x1c   :  { %297 = vsyncadd [#allocation7], 4294966784  ;;  %v59_v0 = vld [vmem:[#allocation6 + $0x18] sm:$0xff]  ;;  %v58_v1 = vld [vmem:[#allocation6 + $0x10] sm:$0xff]  ;;  %vm60_vm0 = vcmask 261120   ;;  %s304_s0 = smov [#allocation8]  }
  0x1d   :  { %207 = vmatprep.subr.mxu0 %v59_v0  ;;  %221 = vmatprep.subr.mxu1 %v59_v0  ;;  %v57_v2 = vld [vmem:[#allocation6 + $0x8] sm:$0xff]  ;;  %v56_v3 = vld [vmem:[#allocation6] sm:$0xff]  ;;  %v54_v5 = vld [vmem:[#allocation3 + $0x10] sm:$0xff]  ;;  %s182_s1 = sshll.u32 %s304_s0, 4  ;;  %s183_s1 = int_to_ptr.vmem [resolvable:$true] %s182_s1 }
  0x1e   :  { %208 = vmatpush3.msra.mxu0 %v59_v0  ;;  %225 = vmatpush3.msra.mxu1 %v59_v0  ;;  %v52_v4 = vld [vmem:[#allocation3] sm:$0xff]  ;;  %v53_v6 = vld [vmem:[#allocation3 + $0x8] sm:$0xff]  ;;  %v55_v7 = vld [vmem:[#allocation3 + $0x18] sm:$0xff]  ;;  %s274_s21 = scalar_lea.vmem %s183_s1, 512  ;;  %p279_p11 = scmp.lt.s32.totalorder %s183_s1, %s183_s1 }
  0x1f   :  { %209 = vmatprep.subr.mxu0 %v58_v1  ;;  %222 = vmatprep.subr.mxu1 %v58_v1  ;;  %p275_p10 = scmp.ne.s32.totalorder %s183_s1, %s274_s21  ;;  %p280_p12 = scmp.lt.s32.totalorder %s274_s21, %s274_s21 }
  0x20   :  { %210 = vmatpush3.msra.mxu0 %v58_v1  ;;  %226 = vmatpush3.msra.mxu1 %v58_v1 }
  0x21   :  { %211 = vmatprep.subr.mxu0 %v57_v2  ;;  %223 = vmatprep.subr.mxu1 %v57_v2  ;;  %p281_p13 = por %p280_p12, %p279_p11 }
  0x22   :  { %212 = vmatpush3.msra.mxu0 %v57_v2  ;;  %227 = vmatpush3.msra.mxu1 %v57_v2 }
  0x23   :  { %213 = vmatprep.subr.mxu0 %v56_v3  ;;  %224 = vmatprep.subr.mxu1 %v56_v3  ;;  %p282_p0 = pnand %p281_p13, %p275_p10 }
  0x24   :  { %214 = vmatpush3.msra.mxu0 %v56_v3  ;;  %228 = vmatpush3.msra.mxu1 %v56_v3 }
  0x25   :  { %215 = vmatprep.mubr.msk.f32.mxu0 %vm60_vm0, %v52_v4  ;;  %218 = vmatprep.mubr.msk.f32.mxu1 %vm60_vm0, %v54_v5 }
  0x26   :  { %216 = vmatmul.mubr.msk.f32.vlgmr.msra.gmra.mxu0 %vm60_vm0, %v53_v6  ;;  %219 = vmatmul.mubr.msk.f32.vlgmr.msra.gmra.mxu1 %vm60_vm0, %v55_v7 }
  0xe6   :  { %v217_v8 = vpop.f32.mrf.mxu0  ;;  %v220_v9 = vpop.f32.mrf.mxu1 }
  0xe7   :  { %174 = vst [vmem:[#allocation8 + $0x8] sm:$0xff] %v217_v8  ;;  %176 = vst [vmem:[#allocation8 + $0x18] sm:$0xff] %v220_v9 }
  0xe8   :  { %v139_v10 = vpop.f32.mrf.mxu0  ;;  %v149_v11 = vpop.f32.mrf.mxu1 }
  0xe9   :  { %173 = vst [vmem:[#allocation8] sm:$0xff] %v139_v10  ;;  %175 = vst [vmem:[#allocation8 + $0x10] sm:$0xff] %v149_v11 }
  0xea   :  { %285 = shalt.err (!%p282_p0)
}
  0xeb   :  { %188 = dma.vmem_to_hbm [thread:$0]  %s183_s1, 512, %s340_s2, [#allocation5], %s301_s12, %s301_s12, %s302_s13  }
  0xec   :  { %298 = dma.done.wait [#allocation5], 512  }
  0xed   :  { %299 = vsyncadd [#allocation5], 4294966784 }
  0xee   :  { %192 = vsyncpa [#allocation4], 1 }
  0xef   :  { %193 = vsyncpa [#allocation7], 1 }
  0xf0   :  { %194 = vsyncpa [#allocation5], 1 }

</bundles_post_ra>
